<compile_context>
chip_gen: v7x
topology: tpu7x:2x2x1
jax: 0.10.0
libtpu: 0.0.40
codegen_flags: <defaults>
</compile_context>

<pallas_src>
import functools

import jax
import jax.numpy as jnp
from jax.experimental import pallas as pl
from jax.experimental.pallas import tpu as pltpu

LN_EPS = 1e-6


def _round_up(n: int, m: int) -> int:
    return ((n + m - 1) // m) * m


def ffn_kernel(x_ref, w1_ref, b1_ref, w2_ref, b2_ref, gamma_ref, beta_ref,
               o_ref, *, d_in: int, mm_dtype):
    """One (tile_rows, d_in_p) row tile: LN -> w1 -> ReLU -> w2 -> +residual."""
    x = x_ref[...].astype(jnp.float32)              # residual kept in f32
    d_in_p = x.shape[-1]

    # --- LayerNorm over the real (un-padded) last dim, eps=1e-6 ---
    if d_in_p == d_in:
        mean = jnp.mean(x, axis=-1, keepdims=True)
        cent = x - mean
        var = jnp.mean(cent * cent, axis=-1, keepdims=True)
    else:
        # padded lanes of x are zero; keep them out of the statistics
        lane = jax.lax.broadcasted_iota(jnp.int32, (1, d_in_p), 1)
        mask = (lane < d_in).astype(jnp.float32)
        inv_d = jnp.float32(1.0 / d_in)
        mean = jnp.sum(x, axis=-1, keepdims=True) * inv_d
        cent = (x - mean) * mask                    # zero in padded lanes
        var = jnp.sum(cent * cent, axis=-1, keepdims=True) * inv_d

    gamma = gamma_ref[...].astype(jnp.float32)      # read once
    beta = beta_ref[...].astype(jnp.float32)
    xn = cent * jax.lax.rsqrt(var + LN_EPS) * gamma + beta  # padded lanes -> 0

    # --- w_2(relu(w_1(x_norm))) on the MXU, f32 accumulation ---
    h = jnp.dot(xn.astype(mm_dtype), w1_ref[...].astype(mm_dtype),
                preferred_element_type=jnp.float32)
    h = jnp.maximum(h + b1_ref[...].astype(jnp.float32), 0.0)
    y = jnp.dot(h.astype(mm_dtype), w2_ref[...].astype(mm_dtype),
                preferred_element_type=jnp.float32)
    y = y + b2_ref[...].astype(jnp.float32)

    # --- dropout (eval: identity) + residual add ---
    o_ref[...] = (y + x).astype(o_ref.dtype)


def positionwise_ffn(x, w1, b1, w2, b2, gamma, beta, *,
                     tile_rows=None, use_bf16_matmul=False):
    """x: (..., d_in); w1: (d_in, d_hid) = torch w_1.weight.T; w2: (d_hid, d_in).

    Returns same shape/dtype as x. tile_rows: 256 is a good default on
    v6e/v7x; use 128 on v5e.
    """
    orig_shape = x.shape
    d_in = orig_shape[-1]
    d_hid = w1.shape[1]
    x2 = x.reshape(-1, d_in)
    n_rows = x2.shape[0]

    # lane-dense padding: last dims become multiples of 128
    d_in_p = _round_up(d_in, 128)
    d_hid_p = _round_up(d_hid, 128)

    # row tile: as big as useful, multiple of 8, never bigger than the problem
    if tile_rows is None:
        tile_rows = 256
    tile_rows = _round_up(min(tile_rows, _round_up(n_rows, 8)), 8)
    n_rows_p = _round_up(n_rows, tile_rows)

    w_dtype = jnp.bfloat16 if use_bf16_matmul else w1.dtype
    mm_dtype = jnp.bfloat16 if use_bf16_matmul else jnp.float32
    f32 = jnp.float32

    # zero padding keeps semantics: padded w1 cols / w2 rows / biases contribute
    # 0, padded gamma/beta are 0 so padded xn lanes are 0, padded x lanes are 0.
    x2p = jnp.pad(x2, ((0, n_rows_p - n_rows), (0, d_in_p - d_in)))
    w1p = jnp.pad(w1, ((0, d_in_p - d_in), (0, d_hid_p - d_hid))).astype(w_dtype)
    w2p = jnp.pad(w2, ((0, d_hid_p - d_hid), (0, d_in_p - d_in))).astype(w_dtype)
    b1p = jnp.pad(b1, (0, d_hid_p - d_hid)).reshape(1, d_hid_p).astype(f32)
    b2p = jnp.pad(b2, (0, d_in_p - d_in)).reshape(1, d_in_p).astype(f32)
    g_p = jnp.pad(gamma, (0, d_in_p - d_in)).reshape(1, d_in_p).astype(f32)
    be_p = jnp.pad(beta, (0, d_in_p - d_in)).reshape(1, d_in_p).astype(f32)

    # VMEM budget: double-buffered x/out tiles + single-copy resident params
    w_bytes = jnp.dtype(w_dtype).itemsize
    x_bytes = jnp.dtype(x.dtype).itemsize
    est = (2 * 2 * tile_rows * d_in_p * x_bytes        # pipelined x / out tiles
           + tile_rows * d_hid_p * 4                   # hidden activation
           + 2 * d_in_p * d_hid_p * w_bytes            # w1 + w2 (single copy)
           + (2 * d_hid_p + 4 * d_in_p) * 4)           # biases / gamma / beta
    vmem_limit = int(min(48 * 1024 * 1024, max(32 * 1024 * 1024, 2 * est)))

    grid = (n_rows_p // tile_rows,)
    kern = functools.partial(ffn_kernel, d_in=d_in, mm_dtype=mm_dtype)
    # whole-array VMEM operand: one resident copy, not double-buffered
    full_vmem = pl.BlockSpec(memory_space=pltpu.MemorySpace.VMEM)

    out = pl.pallas_call(
        kern,
        out_shape=jax.ShapeDtypeStruct((n_rows_p, d_in_p), x.dtype),
        grid_spec=pltpu.PrefetchScalarGridSpec(
            num_scalar_prefetch=0,
            grid=grid,
            in_specs=[
                pl.BlockSpec((tile_rows, d_in_p), lambda i: (i, 0)),  # x tile
                full_vmem,   # w1
                full_vmem,   # b1
                full_vmem,   # w2
                full_vmem,   # b2
                full_vmem,   # gamma
                full_vmem,   # beta
            ],
            out_specs=pl.BlockSpec((tile_rows, d_in_p), lambda i: (i, 0)),
        ),
        compiler_params=pltpu.CompilerParams(
            dimension_semantics=("parallel",),       # row axis shards across TCs
            vmem_limit_bytes=vmem_limit,
        ),
    )(x2p, w1p, b1p, w2p, b2p, g_p, be_p)

    return out[:n_rows, :d_in].reshape(orig_shape)


def reference_ffn(x, w1, b1, w2, b2, gamma, beta):
    """Pure-JAX reference matching the PyTorch forward (eval mode)."""
    xf = x.astype(jnp.float32)
    mean = jnp.mean(xf, axis=-1, keepdims=True)
    var = jnp.mean((xf - mean) ** 2, axis=-1, keepdims=True)
    xn = (xf - mean) / jnp.sqrt(var + LN_EPS) * gamma + beta
    h = jnp.maximum(xn @ w1 + b1, 0.0)
    y = h @ w2 + b2
    return (y + xf).astype(x.dtype)


if __name__ == "__main__":
    # small shapes consistent with the module: batch=2, seq=8, d_in=32, d_hid=64
    batch, seq, d_in, d_hid = 2, 8, 32, 64

    key = jax.random.PRNGKey(0)
    kx, k1, kb1, k2, kb2, kx2 = jax.random.split(key, 6)

    x = jax.random.normal(kx, (batch, seq, d_in), dtype=jnp.float32)

    # deterministic parameter init (shapes match nn.Linear / nn.LayerNorm)
    bound1 = 1.0 / (d_in ** 0.5)
    w1 = jax.random.uniform(k1, (d_in, d_hid), minval=-bound1, maxval=bound1,
                            dtype=jnp.float32)          # = torch w_1.weight.T
    b1 = jax.random.uniform(kb1, (d_hid,), minval=-bound1, maxval=bound1,
                            dtype=jnp.float32)
    bound2 = 1.0 / (d_hid ** 0.5)
    w2 = jax.random.uniform(k2, (d_hid, d_in), minval=-bound2, maxval=bound2,
                            dtype=jnp.float32)          # = torch w_2.weight.T
    b2 = jax.random.uniform(kb2, (d_in,), minval=-bound2, maxval=bound2,
                            dtype=jnp.float32)
    gamma = jnp.ones((d_in,), dtype=jnp.float32)         # LayerNorm.weight
    beta = jnp.zeros((d_in,), dtype=jnp.float32)         # LayerNorm.bias

    ref = reference_ffn(x, w1, b1, w2, b2, gamma, beta)

    # f32 MXU path
    out = jax.block_until_ready(positionwise_ffn(x, w1, b1, w2, b2, gamma, beta))
    assert out.shape == x.shape and out.dtype == x.dtype
    assert jnp.allclose(out, ref, atol=1e-4, rtol=1e-4), "f32 path mismatch"

    # bf16 MXU path (f32 LN stats + f32 accumulation) -- small drift expected
    out_bf16 = jax.block_until_ready(
        positionwise_ffn(x, w1, b1, w2, b2, gamma, beta, use_bf16_matmul=True))
    assert jnp.allclose(out_bf16, ref, atol=1e-1, rtol=5e-2), "bf16 path mismatch"

    # ragged row count: exercises row padding + masked-LayerNorm lane padding
    x_odd = jax.random.normal(kx2, (3, 5, d_in), dtype=jnp.float32)
    out_odd = jax.block_until_ready(
        positionwise_ffn(x_odd, w1, b1, w2, b2, gamma, beta, tile_rows=256))
    ref_odd = reference_ffn(x_odd, w1, b1, w2, b2, gamma, beta)
    assert jnp.allclose(out_odd, ref_odd, atol=1e-4, rtol=1e-4), "ragged mismatch"

    print("KERNEL_OK")
</pallas_src>

<mosaic_0001>
module attributes {stable_mosaic.version = 11 : i64} {
  func.func @ffn_kernel(%arg0: i32, %arg1: memref<16x128xf32, #tpu.memory_space<vmem>>, %arg2: memref<128x128xf32, #tpu.memory_space<vmem>>, %arg3: memref<1x128xf32, #tpu.memory_space<vmem>>, %arg4: memref<128x128xf32, #tpu.memory_space<vmem>>, %arg5: memref<1x128xf32, #tpu.memory_space<vmem>>, %arg6: memref<1x128xf32, #tpu.memory_space<vmem>>, %arg7: memref<1x128xf32, #tpu.memory_space<vmem>>, %arg8: memref<16x128xf32, #tpu.memory_space<vmem>>) attributes {dimension_semantics = [#tpu.dimension_semantics<parallel>], iteration_bounds = array<i64: 1>, scalar_prefetch = 0 : i64, scratch_operands = 0 : i64, tpu.core_type = #tpu.core_type<tc>, window_params = [{transform_indices = @transform_0, window_bounds = array<i64: 16, 128>}, {pipeline_mode = #tpu.pipeline_mode<synchronous>, transform_indices = @transform_1, window_bounds = array<i64: 128, 128>}, {pipeline_mode = #tpu.pipeline_mode<synchronous>, transform_indices = @transform_2, window_bounds = array<i64: 1, 128>}, {pipeline_mode = #tpu.pipeline_mode<synchronous>, transform_indices = @transform_3, window_bounds = array<i64: 128, 128>}, {pipeline_mode = #tpu.pipeline_mode<synchronous>, transform_indices = @transform_4, window_bounds = array<i64: 1, 128>}, {pipeline_mode = #tpu.pipeline_mode<synchronous>, transform_indices = @transform_5, window_bounds = array<i64: 1, 128>}, {pipeline_mode = #tpu.pipeline_mode<synchronous>, transform_indices = @transform_6, window_bounds = array<i64: 1, 128>}, {transform_indices = @transform_7, window_bounds = array<i64: 16, 128>}]} {
    %c0 = arith.constant 0 : index
    %c0_0 = arith.constant 0 : index
    %0 = vector.load %arg1[%c0, %c0_0] : memref<16x128xf32, #tpu.memory_space<vmem>>, vector<16x128xf32>
    %1 = tpu.iota {dimensions = array<i32: 1>} : vector<1x128xi32>
    %c32_i32 = arith.constant 32 : i32
    %2 = vector.broadcast %c32_i32 : i32 to vector<1x128xi32>
    %3 = arith.cmpi slt, %1, %2 : vector<1x128xi32>
    %4 = arith.extui %3 : vector<1x128xi1> to vector<1x128xi32>
    %5 = arith.sitofp %4 : vector<1x128xi32> to vector<1x128xf32>
    %cst = arith.constant dense<0.000000e+00> : vector<16xf32>
    %6 = vector.multi_reduction <add>, %0, %cst [1] : vector<16x128xf32> to vector<16xf32>
    %7 = vector.shape_cast %6 : vector<16xf32> to vector<16x1xf32>
    %cst_1 = arith.constant 3.125000e-02 : f32
    %8 = vector.broadcast %cst_1 : f32 to vector<16x1xf32>
    %9 = arith.mulf %7, %8 : vector<16x1xf32>
    %10 = vector.broadcast %9 : vector<16x1xf32> to vector<16x128xf32>
    %11 = arith.subf %0, %10 : vector<16x128xf32>
    %12 = vector.broadcast %5 : vector<1x128xf32> to vector<16x128xf32>
    %13 = arith.mulf %11, %12 : vector<16x128xf32>
    %14 = arith.mulf %13, %13 : vector<16x128xf32>
    %cst_2 = arith.constant dense<0.000000e+00> : vector<16xf32>
    %15 = vector.multi_reduction <add>, %14, %cst_2 [1] : vector<16x128xf32> to vector<16xf32>
    %16 = vector.shape_cast %15 : vector<16xf32> to vector<16x1xf32>
    %cst_3 = arith.constant 3.125000e-02 : f32
    %17 = vector.broadcast %cst_3 : f32 to vector<16x1xf32>
    %18 = arith.mulf %16, %17 : vector<16x1xf32>
    %c0_4 = arith.constant 0 : index
    %c0_5 = arith.constant 0 : index
    %19 = vector.load %arg6[%c0_4, %c0_5] : memref<1x128xf32, #tpu.memory_space<vmem>>, vector<1x128xf32>
    %c0_6 = arith.constant 0 : index
    %c0_7 = arith.constant 0 : index
    %20 = vector.load %arg7[%c0_6, %c0_7] : memref<1x128xf32, #tpu.memory_space<vmem>>, vector<1x128xf32>
    %cst_8 = arith.constant 9.99999997E-7 : f32
    %21 = vector.broadcast %cst_8 : f32 to vector<16x1xf32>
    %22 = arith.addf %18, %21 : vector<16x1xf32>
    %23 = math.rsqrt %22 : vector<16x1xf32>
    %24 = vector.broadcast %23 : vector<16x1xf32> to vector<16x128xf32>
    %25 = arith.mulf %13, %24 : vector<16x128xf32>
    %26 = vector.broadcast %19 : vector<1x128xf32> to vector<16x128xf32>
    %27 = arith.mulf %25, %26 : vector<16x128xf32>
    %28 = vector.broadcast %20 : vector<1x128xf32> to vector<16x128xf32>
    %29 = arith.addf %27, %28 : vector<16x128xf32>
    %c0_9 = arith.constant 0 : index
    %c0_10 = arith.constant 0 : index
    %30 = vector.load %arg2[%c0_9, %c0_10] : memref<128x128xf32, #tpu.memory_space<vmem>>, vector<128x128xf32>
    %cst_11 = arith.constant dense<0.000000e+00> : vector<16x128xf32>
    %31 = tpu.matmul %29, %30, %cst_11 {dimension_numbers = #tpu.dot_dimension_numbers<[1], [0], [0], [1], [0, 0, 1, 1], [], []>} : vector<16x128xf32>, vector<128x128xf32>, vector<16x128xf32> -> vector<16x128xf32>
    %c0_12 = arith.constant 0 : index
    %c0_13 = arith.constant 0 : index
    %32 = vector.load %arg3[%c0_12, %c0_13] : memref<1x128xf32, #tpu.memory_space<vmem>>, vector<1x128xf32>
    %33 = vector.broadcast %32 : vector<1x128xf32> to vector<16x128xf32>
    %34 = arith.addf %31, %33 : vector<16x128xf32>
    %cst_14 = arith.constant 0.000000e+00 : f32
    %35 = vector.broadcast %cst_14 : f32 to vector<16x128xf32>
    %36 = arith.maximumf %34, %35 : vector<16x128xf32>
    %c0_15 = arith.constant 0 : index
    %c0_16 = arith.constant 0 : index
    %37 = vector.load %arg4[%c0_15, %c0_16] : memref<128x128xf32, #tpu.memory_space<vmem>>, vector<128x128xf32>
    %cst_17 = arith.constant dense<0.000000e+00> : vector<16x128xf32>
    %38 = tpu.matmul %36, %37, %cst_17 {dimension_numbers = #tpu.dot_dimension_numbers<[1], [0], [0], [1], [0, 0, 1, 1], [], []>} : vector<16x128xf32>, vector<128x128xf32>, vector<16x128xf32> -> vector<16x128xf32>
    %c0_18 = arith.constant 0 : index
    %c0_19 = arith.constant 0 : index
    %39 = vector.load %arg5[%c0_18, %c0_19] : memref<1x128xf32, #tpu.memory_space<vmem>>, vector<1x128xf32>
    %40 = vector.broadcast %39 : vector<1x128xf32> to vector<16x128xf32>
    %41 = arith.addf %38, %40 : vector<16x128xf32>
    %42 = arith.addf %41, %0 : vector<16x128xf32>
    %c0_20 = arith.constant 0 : index
    %c0_21 = arith.constant 0 : index
    %43 = vector.load %arg8[%c0_20, %c0_21] : memref<16x128xf32, #tpu.memory_space<vmem>>, vector<16x128xf32>
    tpu.vector_store %arg8[%c0_20, %c0_21], %42 {strides = array<i32>} : memref<16x128xf32, #tpu.memory_space<vmem>>, vector<16x128xf32>,
    return
  }
  func.func @transform_0(%arg0: i32) -> (i32, i32) {
    %c0_i32 = arith.constant 0 : i32
    %c0_i32_0 = arith.constant 0 : i32
    return %arg0, %c0_i32 : i32, i32
  }
  func.func @transform_1(%arg0: i32) -> (i32, i32) {
    %c0_i32 = arith.constant 0 : i32
    %c0_i32_0 = arith.constant 0 : i32
    %c0_i32_1 = arith.constant 0 : i32
    return %c0_i32, %c0_i32_0 : i32, i32
  }
  func.func @transform_2(%arg0: i32) -> (i32, i32) {
    %c0_i32 = arith.constant 0 : i32
    %c0_i32_0 = arith.constant 0 : i32
    %c0_i32_1 = arith.constant 0 : i32
    return %c0_i32, %c0_i32_0 : i32, i32
  }
  func.func @transform_3(%arg0: i32) -> (i32, i32) {
    %c0_i32 = arith.constant 0 : i32
    %c0_i32_0 = arith.constant 0 : i32
    %c0_i32_1 = arith.constant 0 : i32
    return %c0_i32, %c0_i32_0 : i32, i32
  }
  func.func @transform_4(%arg0: i32) -> (i32, i32) {
    %c0_i32 = arith.constant 0 : i32
    %c0_i32_0 = arith.constant 0 : i32
    %c0_i32_1 = arith.constant 0 : i32
    return %c0_i32, %c0_i32_0 : i32, i32
  }
  func.func @transform_5(%arg0: i32) -> (i32, i32) {
    %c0_i32 = arith.constant 0 : i32
    %c0_i32_0 = arith.constant 0 : i32
    %c0_i32_1 = arith.constant 0 : i32
    return %c0_i32, %c0_i32_0 : i32, i32
  }
  func.func @transform_6(%arg0: i32) -> (i32, i32) {
    %c0_i32 = arith.constant 0 : i32
    %c0_i32_0 = arith.constant 0 : i32
    %c0_i32_1 = arith.constant 0 : i32
    return %c0_i32, %c0_i32_0 : i32, i32
  }
  func.func @transform_7(%arg0: i32) -> (i32, i32) {
    %c0_i32 = arith.constant 0 : i32
    %c0_i32_0 = arith.constant 0 : i32
    return %arg0, %c0_i32 : i32, i32
  }
}

</mosaic_0001>

<bundles_post_ra>
// kernel: tpu_custom_call.1
= control target key start
LH: loop header
LB: loop body
LE: loop exit
PB: predicated region body
PF: predicated region fallthrough
CT: control target
= control target key end

     0   :  { %12 = vsyncpa [#allocation3], 0  ;;  %s763_s0 = inlined_call_operand.hbm [shape: f32[16,128], index: 0, kind: input, shape index: {}]   ;;  %s764_s1 = inlined_call_operand.hbm [shape: f32[128,128], index: 1, kind: input, shape index: {}]   ;;  %s765_s2 = inlined_call_operand.vmem [shape: f32[1,128], index: 2, kind: input, shape index: {}]   ;;  %s766_s3 = inlined_call_operand.hbm [shape: f32[128,128], index: 3, kind: input, shape index: {}]   ;;  %s767_s4 = inlined_call_operand.vmem [shape: f32[1,128], index: 4, kind: input, shape index: {}]   ;;  %s768_s5 = inlined_call_operand.vmem [shape: f32[1,128], index: 5, kind: input, shape index: {}]   ;;  %s769_s6 = inlined_call_operand.vmem [shape: f32[1,128], index: 6, kind: input, shape index: {}]   ;;  %s770_s7 = inlined_call_operand.hbm [shape: f32[16,128], index: 7, kind: output, shape index: {}]  }
   0x1   :  { %13 = vsyncpa [#allocation6], 0 }
   0x2   :  { %14 = vsyncpa [#allocation4], 0  ;;  %s617_s24 = smov [#allocation5]   ;;  %s618_s26 = smov [#allocation2]  }
   0x3   :  { %s32_s25 = sshll.u32 %s617_s24, 4  ;;  %s20_s27 = sshll.u32 %s618_s26, 4  ;;  %s33_s25 = int_to_ptr.vmem [resolvable:$true] %s32_s25  ;;  %s664_s27 = int_to_ptr.vmem [resolvable:$true] %s20_s27 }
   0x4   :  { %s523_s30 = scalar_lea.hbm %s764_s1, 2048 }
   0x5   :  { %p524_p0 = scmp.ne.s32.totalorder %s764_s1, %s523_s30  ;;  %p527_p1 = scmp.lt.u32.totalorder %s523_s30, %s764_s1 }
   0x7   :  { %p529_p2 = pnand %p527_p1, %p524_p0 }
   0x9   :  { %532 = shalt.err (!%p529_p2)
}
   0xa   :  { %s533_s12 = scalar_lea.vmem %s33_s25, 2048  ;;  %p538_p4 = scmp.lt.s32.totalorder %s33_s25, %s33_s25 }
   0xb   :  { %p534_p3 = scmp.ne.s32.totalorder %s33_s25, %s533_s12  ;;  %p539_p5 = scmp.lt.s32.totalorder %s533_s12, %s533_s12 }
   0xd   :  { %p540_p6 = por %p539_p5, %p538_p4 }
   0xf   :  { %p541_p7 = pnand %p540_p6, %p534_p3 }
  0x11   :  { %544 = shalt.err (!%p541_p7)
}
  0x12   :  { %s619_s13 = smov 128   ;;  %s620_s14 = smov 8  }
  0x13   :  { %38 = dma.hbm_to_vmem [thread:$0]  %s764_s1, 2048, %s33_s25, [#allocation6], %s619_s13, %s619_s13, %s620_s14  }
  0x14   :  { %s545_s19 = scalar_lea.hbm %s763_s0, 256 }
  0x15   :  { %p546_p8 = scmp.ne.s32.totalorder %s763_s0, %s545_s19  ;;  %p549_p9 = scmp.lt.u32.totalorder %s545_s19, %s763_s0 }
  0x17   :  { %p551_p10 = pnand %p549_p9, %p546_p8 }
  0x19   :  { %554 = shalt.err (!%p551_p10)
}
  0x1a   :  { %s555_s24 = scalar_lea.vmem %s664_s27, 256  ;;  %p560_p12 = scmp.lt.s32.totalorder %s664_s27, %s664_s27 }
  0x1b   :  { %p556_p11 = scmp.ne.s32.totalorder %s664_s27, %s555_s24  ;;  %p561_p13 = scmp.lt.s32.totalorder %s555_s24, %s555_s24 }
  0x1d   :  { %p562_p0 = por %p561_p13, %p560_p12 }
  0x1f   :  { %p563_p1 = pnand %p562_p0, %p556_p11 }
  0x21   :  { %566 = shalt.err (!%p563_p1)
}
  0x22   :  { %26 = dma.hbm_to_vmem [thread:$0]  %s763_s0, 256, %s664_s27, [#allocation3], %s619_s13, %s619_s13, %s620_s14  }
  0x23   :  { %s621_s26 = smov [#allocation7]   ;;  %s567_s8 = scalar_lea.hbm %s766_s3, 2048 }
  0x24   :  { %s46_s28 = sshll.u32 %s621_s26, 4  ;;  %p568_p2 = scmp.ne.s32.totalorder %s766_s3, %s567_s8  ;;  %s47_s28 = int_to_ptr.vmem [resolvable:$true] %s46_s28 }
  0x25   :  { %p571_p3 = scmp.lt.u32.totalorder %s567_s8, %s766_s3 }
  0x27   :  { %p573_p4 = pnand %p571_p3, %p568_p2 }
  0x29   :  { %576 = shalt.err (!%p573_p4)
}
  0x2a   :  { %s577_s15 = scalar_lea.vmem %s47_s28, 2048  ;;  %p582_p6 = scmp.lt.s32.totalorder %s47_s28, %s47_s28 }
  0x2b   :  { %p578_p5 = scmp.ne.s32.totalorder %s47_s28, %s577_s15  ;;  %p583_p7 = scmp.lt.s32.totalorder %s577_s15, %s577_s15 }
  0x2d   :  { %p584_p8 = por %p583_p7, %p582_p6 }
  0x2f   :  { %p585_p9 = pnand %p584_p8, %p578_p5 }
  0x31   :  { %588 = shalt.err (!%p585_p9)
}
  0x32   :  { %52 = dma.hbm_to_vmem [thread:$0]  %s766_s3, 2048, %s47_s28, [#allocation6], %s619_s13, %s619_s13, %s620_s14  }
  0x33   :  { %611 = dma.done.wait [#allocation3], 256  }
  0x34   :  { %612 = vsyncadd [#allocation3], 4294967040 }
  0x35   :  { %613 = dma.done.wait [#allocation6], 4096  }
  0x36   :  { %614 = vsyncadd [#allocation6], 4294963200  ;;  %v716_v0 = vld [vmem:[#allocation2] sm:$0xff]  ;;  %v719_v1 = vld [vmem:[#allocation2 + $0x8] sm:$0xff]  ;;  %v70_v8 = vlaneseq  ;;  %v622_v12 = vmov 0.0   ;;  %s623_s21 = smov [#allocation8]  }
  0x37   :  { %75 = vadd.xlane.f32.xlu0 %v716_v0  ;;  %v117_v2 = vld [vmem:[#allocation5] sm:$0xff]  ;;  %v118_v3 = vld [vmem:[#allocation5 + $0x8] sm:$0xff]  ;;  %v119_v4 = vld [vmem:[#allocation5 + $0x10] sm:$0xff]  ;;  %s324_s22 = sshll.u32 %s623_s21, 4  ;;  %s325_s22 = int_to_ptr.vmem [resolvable:$true] %s324_s22 }
  0x38   :  { %v448_v5 = vpack.c.bf16 %v118_v3, %v117_v2  ;;  %v120_v6 = vld [vmem:[#allocation5 + $0x18] sm:$0xff]  ;;  %v71_v9 = vand.u32 127, %v70_v8  ;;  %v121_v22 = vld [vmem:[#allocation5 + $0x20] sm:$0xff]  ;;  %v122_v23 = vld [vmem:[#allocation5 + $0x28] sm:$0xff]  ;;  %p594_p11 = scmp.lt.s32.totalorder %s325_s22, %s325_s22 }
  0x39   :  { %v452_v7 = vpack.c.bf16 %v120_v6, %v119_v4  ;;  %v456_v24 = vpack.c.bf16 %v122_v23, %v121_v22  ;;  %v123_v25 = vld [vmem:[#allocation5 + $0x30] sm:$0xff]  ;;  %v124_v26 = vld [vmem:[#allocation5 + $0x38] sm:$0xff]  ;;  %v125_v28 = vld [vmem:[#allocation5 + $0x40] sm:$0xff] }
  0x3a   :  { %449 = vmatprep.subr.bf16.mxu0 %v448_v5  ;;  %vm72_vm0 = vcmp.lt.s32.totalorder %v71_v9, 32  ;;  %v460_v27 = vpack.c.bf16 %v124_v26, %v123_v25  ;;  %v126_v29 = vld [vmem:[#allocation5 + $0x48] sm:$0xff]  ;;  %v127_v31 = vld [vmem:[#allocation5 + $0x50] sm:$0xff]  ;;  %v128_v32 = vld [vmem:[#allocation5 + $0x58] sm:$0xff] }
  0x3b   :  { %77 = vadd.xlane.f32.xlu0 %v719_v1  ;;  %451 = vmatpush3.bf16.msra.mxu0 %v448_v5  ;;  %v337_v13 = vsel %vm72_vm0, 1.0, %v622_v12  ;;  %v464_v30 = vpack.c.bf16 %v126_v29, %v125_v28  ;;  %v129_v33 = vld [vmem:[#allocation5 + $0x60] sm:$0xff]  ;;  %v468_v34 = vpack.c.bf16 %v128_v32, %v127_v31  ;;  %v130_v35 = vld [vmem:[#allocation5 + $0x68] sm:$0xff]  ;;  %v131_v37 = vld [vmem:[#allocation5 + $0x70] sm:$0xff] }
  0x3c   :  { %453 = vmatprep.subr.bf16.mxu0 %v452_v7  ;;  %v472_v36 = vpack.c.bf16 %v130_v35, %v129_v33  ;;  %v132_v38 = vld [vmem:[#allocation5 + $0x78] sm:$0xff]  ;;  %v217_v40 = vld [vmem:[#allocation7] sm:$0xff]  ;;  %v218_v41 = vld [vmem:[#allocation7 + $0x8] sm:$0xff] }
  0x3d   :  { %v476_v39 = vpack.c.bf16 %v132_v38, %v131_v37  ;;  %v219_v42 = vld [vmem:[#allocation7 + $0x10] sm:$0xff]  ;;  %v480_v43 = vpack.c.bf16 %v218_v41, %v217_v40  ;;  %v220_v44 = vld [vmem:[#allocation7 + $0x18] sm:$0xff]  ;;  %v221_v46 = vld [vmem:[#allocation7 + $0x20] sm:$0xff] }
  0x3e   :  { %v484_v45 = vpack.c.bf16 %v220_v44, %v219_v42  ;;  %v222_v47 = vld [vmem:[#allocation7 + $0x28] sm:$0xff]  ;;  %v223_v49 = vld [vmem:[#allocation7 + $0x30] sm:$0xff]  ;;  %v224_v50 = vld [vmem:[#allocation7 + $0x38] sm:$0xff] }
  0x3f   :  { %455 = vmatpush3.bf16.msra.mxu0 %v452_v7  ;;  %481 = vmatprep.subr.bf16.mxu1 %v480_v43  ;;  %v488_v48 = vpack.c.bf16 %v222_v47, %v221_v46  ;;  %v492_v51 = vpack.c.bf16 %v224_v50, %v223_v49  ;;  %v225_v52 = vld [vmem:[#allocation7 + $0x40] sm:$0xff]  ;;  %v226_v53 = vld [vmem:[#allocation7 + $0x48] sm:$0xff]  ;;  %v227_v55 = vld [vmem:[#allocation7 + $0x50] sm:$0xff] }
  0x40   :  { %457 = vmatprep.subr.bf16.mxu0 %v456_v24  ;;  %483 = vmatpush3.bf16.msra.mxu1 %v480_v43  ;;  %v496_v54 = vpack.c.bf16 %v226_v53, %v225_v52  ;;  %v228_v56 = vld [vmem:[#allocation7 + $0x58] sm:$0xff]  ;;  %v229_v58 = vld [vmem:[#allocation7 + $0x60] sm:$0xff]  ;;  %v230_v59 = vld [vmem:[#allocation7 + $0x68] sm:$0xff] }
  0x41   :  { %485 = vmatprep.subr.bf16.mxu1 %v484_v45  ;;  %v500_v57 = vpack.c.bf16 %v228_v56, %v227_v55  ;;  %v504_v60 = vpack.c.bf16 %v230_v59, %v229_v58  ;;  %v338_v6 = vld [vmem:[%s768_s5] ss:$0 sm:$0xff] }
  0x42   :  { %v339_v8 = vld [vmem:[%s769_s6] ss:$0 sm:$0xff] }
  0x43   :  { %459 = vmatpush3.bf16.msra.mxu0 %v456_v24  ;;  %v341_v25 = vld [vmem:[%s767_s4] ss:$0 sm:$0xff] }
  0x44   :  { %461 = vmatprep.subr.bf16.mxu0 %v460_v27  ;;  %487 = vmatpush3.bf16.msra.mxu1 %v484_v45 }
  0x45   :  { %489 = vmatprep.subr.bf16.mxu1 %v488_v48 }
  0x47   :  { %463 = vmatpush3.bf16.msra.mxu0 %v460_v27 }
  0x48   :  { %465 = vmatprep.subr.bf16.mxu0 %v464_v30  ;;  %491 = vmatpush3.bf16.msra.mxu1 %v488_v48 }
  0x49   :  { %493 = vmatprep.subr.bf16.mxu1 %v492_v51 }
  0x4b   :  { %467 = vmatpush3.bf16.msra.mxu0 %v464_v30 }
  0x4c   :  { %469 = vmatprep.subr.bf16.mxu0 %v468_v34  ;;  %495 = vmatpush3.bf16.msra.mxu1 %v492_v51 }
  0x4d   :  { %497 = vmatprep.subr.bf16.mxu1 %v496_v54 }
  0x4f   :  { %471 = vmatpush3.bf16.msra.mxu0 %v468_v34 }
  0x50   :  { %473 = vmatprep.subr.bf16.mxu0 %v472_v36  ;;  %499 = vmatpush3.bf16.msra.mxu1 %v496_v54 }
  0x51   :  { %501 = vmatprep.subr.bf16.mxu1 %v500_v57 }
  0x53   :  { %475 = vmatpush3.bf16.msra.mxu0 %v472_v36 }
  0x54   :  { %477 = vmatprep.subr.bf16.mxu0 %v476_v39  ;;  %503 = vmatpush3.bf16.msra.mxu1 %v500_v57 }
  0x55   :  { %505 = vmatprep.subr.bf16.mxu1 %v504_v60 }
  0x57   :  { %479 = vmatpush3.bf16.msra.mxu0 %v476_v39 }
  0x58   :  { %507 = vmatpush3.bf16.msra.mxu1 %v504_v60 }
  0xc4   :  { %v76_v10 = vpop.xlane.xlu0 %75 }
  0xc5   :  { %v79_v11 = vmul.f32 0.03125, %v76_v10 }
  0xc7   :  { %v81_v14 = vsub.f32 %v716_v0, %v79_v11 }
  0xc8   :  { %v78_v15 = vpop.xlane.xlu0 %77 }
  0xc9   :  { %v80_v16 = vmul.f32 0.03125, %v78_v15  ;;  %v723_v17 = vmul.f32 %v337_v13, %v81_v14  ;;  %v231_v15 = vld [vmem:[#allocation7 + $0x70] sm:$0xff] }
  0xcb   :  { %v82_v18 = vsub.f32 %v719_v1, %v80_v16  ;;  %v85_v19 = vmul.f32 %v723_v17, %v723_v17  ;;  %v232_v16 = vld [vmem:[#allocation7 + $0x78] sm:$0xff] }
  0xcd   :  { %87 = vadd.xlane.f32.xlu1 %v85_v19  ;;  %v728_v20 = vmul.f32 %v337_v13, %v82_v18  ;;  %v508_v18 = vpack.c.bf16 %v232_v16, %v231_v15 }
  0xcf   :  { %v86_v21 = vmul.f32 %v728_v20, %v728_v20  ;;  %509 = vmatprep.subr.bf16.mxu1 %v508_v18 }
  0xd0   :  { %511 = vmatpush3.bf16.msra.mxu1 %v508_v18 }
  0xd1   :  { %89 = vadd.xlane.f32.xlu1 %v86_v21 }
 0x15a   :  { %v88_v61 = vpop.xlane.xlu1 %87 }
 0x15b   :  { %v91_v62 = vmul.f32 0.03125, %v88_v61 }
 0x15d   :  { %v95_v63 = vadd.f32 1e-06, %v91_v62 }
 0x15e   :  { %v90_v2 = vpop.xlane.xlu1 %89 }
 0x15f   :  { %519 = vrsqrt.f32 %v95_v63  ;;  %v92_v3 = vmul.f32 0.03125, %v90_v2 }
 0x161   :  { %v96_v4 = vadd.f32 1e-06, %v92_v3 }
 0x163   :  { %521 = vrsqrt.f32 %v96_v4 }
 0x169   :  { %v520_v5 = vpop.eup %519 }
 0x16a   :  { %v99_v7 = vmul.f32 %v520_v5, %v723_v17  ;;  %v340_v17 = vld [vmem:[%s765_s2] ss:$0 sm:$0xff]  ;;  %s589_s2 = scalar_lea.vmem %s325_s22, 256 }
 0x16b   :  { %p590_p10 = scmp.ne.s32.totalorder %s325_s22, %s589_s2  ;;  %p595_p12 = scmp.lt.s32.totalorder %s589_s2, %s589_s2 }
 0x16c   :  { %v107_v9 = vmul.f32 %v338_v6, %v99_v7 }
 0x16d   :  { %v522_v10 = vpop.eup %521  ;;  %p596_p13 = por %p595_p12, %p594_p11 }
 0x16e   :  { %v100_v11 = vmul.f32 %v522_v10, %v728_v20  ;;  %v115_v12 = vadd.f32 %v339_v8, %v107_v9 }
 0x16f   :  { %p597_p0 = pnand %p596_p13, %p590_p10 }
 0x170   :  { %v108_v13 = vmul.f32 %v338_v6, %v100_v11  ;;  %410 = vmatprep.mubr.f32.mxu0 %v115_v12 }
 0x172   :  { %v116_v14 = vadd.f32 %v339_v8, %v108_v13 }
 0x174   :  { %411 = vmatmul.mubr.f32.vlgmr.msra.gmra.mrb[0].mxu0 %v116_v14 }
 0x247   :  { %v412_v19 = vpop.f32.mrb[0].mxu0 }
 0x248   :  { %v212_v21 = vadd.f32 %v412_v19, %v340_v17  ;;  %v206_v22 = vpop.f32.mrb[1].mxu0 }
 0x249   :  { %v207_v23 = vadd.f32 %v340_v17, %v206_v22 }
 0x24a   :  { %v216_v20 = vmax.f32 %v212_v21, 0.0 }
 0x24b   :  { %v215_v24 = vmax.f32 %v207_v23, 0.0 }
 0x24d   :  { %445 = vmatprep.mubr.f32.mxu1 %v215_v24 }
 0x24e   :  { %446 = vmatmul.mubr.f32.vlgmr.msra.gmra.mrb[0].mxu1 %v216_v20 }
 0x321   :  { %v447_v26 = vpop.f32.mrb[0].mxu1 }
 0x322   :  { %v312_v27 = vadd.f32 %v447_v26, %v341_v25  ;;  %v306_v28 = vpop.f32.mrb[1].mxu1 }
 0x323   :  { %v307_v29 = vadd.f32 %v341_v25, %v306_v28 }
 0x324   :  { %v316_v30 = vadd.f32 %v312_v27, %v719_v1 }
 0x325   :  { %v315_v31 = vadd.f32 %v307_v29, %v716_v0 }
 0x326   :  { %318 = vst [vmem:[#allocation8 + $0x8] sm:$0xff] %v316_v30 }
 0x327   :  { %317 = vst [vmem:[#allocation8] sm:$0xff] %v315_v31 }
 0x328   :  { %600 = shalt.err (!%p597_p0)
}
 0x329   :  { %s601_s24 = scalar_lea.hbm %s770_s7, 256 }
 0x32a   :  { %p602_p1 = scmp.ne.s32.totalorder %s770_s7, %s601_s24  ;;  %p605_p2 = scmp.lt.u32.totalorder %s601_s24, %s770_s7 }
 0x32c   :  { %p607_p3 = pnand %p605_p2, %p602_p1 }
 0x32e   :  { %610 = shalt.err (!%p607_p3)
}
 0x32f   :  { %330 = dma.vmem_to_hbm [thread:$0]  %s325_s22, 256, %s770_s7, [#allocation4], %s619_s13, %s619_s13, %s620_s14  }
 0x330   :  { %615 = dma.done.wait [#allocation4], 256  }
 0x331   :  { %616 = vsyncadd [#allocation4], 4294967040 }
 0x332   :  { %334 = vsyncpa [#allocation3], 1 }
 0x333   :  { %335 = vsyncpa [#allocation6], 1 }
 0x334   :  { %336 = vsyncpa [#allocation4], 1 }

</bundles_post_ra>
